<compile_context>
chip_gen: v5e
topology: v5e:2x2
jax: 0.10.0
libtpu: 0.0.40
codegen_flags: <defaults>
</compile_context>

<pallas_src>
import functools
import math

import jax
import jax.numpy as jnp
from jax import lax
from jax.experimental import pallas as pl
from jax.experimental.pallas import tpu as pltpu


def make_positional_encoding_table(d_model: int, max_len: int) -> jnp.ndarray:
    """Sinusoidal table identical to the PyTorch __init__ (shape (max_len, D))."""
    position = jnp.arange(max_len, dtype=jnp.float32)[:, None]                # (L, 1)
    div_term = jnp.exp(jnp.arange(0, d_model, 2, dtype=jnp.float32)
                       * (-math.log(10000.0) / d_model))                      # (D/2,)
    pe = jnp.zeros((max_len, d_model), dtype=jnp.float32)
    pe = pe.at[:, 0::2].set(jnp.sin(position * div_term))
    pe = pe.at[:, 1::2].set(jnp.cos(position * div_term))
    return pe


def pe_add_kernel(seed_ref, x_ref, pe_ref, o_ref, *, dropout_rate, total_cols):
    # seed_ref: (1,) int32 in SMEM (scalar prefetch)   -- unused when p == 0
    # x_ref:    (Rblk, Cblk)       -- flattened (batch, seq*d_model) tile
    # pe_ref:   (1,    Cblk) f32   -- positional-encoding slab (row broadcast)
    # o_ref:    (Rblk, Cblk)
    y = x_ref[...].astype(jnp.float32) + pe_ref[...]          # VPU broadcast add

    if dropout_rate > 0.0:                                    # traced only in training
        blk_rows, blk_cols = x_ref.shape
        # Global element coordinates -> dropout mask invariant to the tiling.
        row0 = pl.program_id(1) * blk_rows                    # grid = (cols, rows)
        col0 = pl.program_id(0) * blk_cols
        rows = (lax.broadcasted_iota(jnp.int32, y.shape, 0) + row0).astype(jnp.uint32)
        cols = (lax.broadcasted_iota(jnp.int32, y.shape, 1) + col0).astype(jnp.uint32)
        idx = rows * jnp.uint32(total_cols) + cols
        # murmur3-style finalizer mixing (global flat index, seed); plain 32-bit
        # VPU ops -> lowers both on Mosaic and in interpret mode.
        h = idx ^ (seed_ref[0].astype(jnp.uint32) * jnp.uint32(0x9E3779B9))
        h = h ^ (h >> 16)
        h = h * jnp.uint32(0x85EBCA6B)
        h = h ^ (h >> 13)
        h = h * jnp.uint32(0xC2B2AE35)
        h = h ^ (h >> 16)
        r24 = (h >> 8).astype(jnp.int32)                      # 24 uniform bits, >= 0
        thresh = jnp.int32(min(int(dropout_rate * (1 << 24)), (1 << 24) - 1))
        keep = (r24 >= thresh).astype(jnp.float32)            # P(keep) = 1 - p
        y = y * (keep * jnp.float32(1.0 / (1.0 - dropout_rate)))   # single fused mul

    o_ref[...] = y.astype(o_ref.dtype)


def _choose_blocks(B, SD, itemsize):
    """Pick (block_rows, block_cols, n_row, n_col) for the flattened (B, SD) view."""
    MAX_COLS = 32768                              # lane-dense cap per column block
    if SD <= MAX_COLS:
        block_cols = SD                           # full row -> always layout-legal
    else:
        n_col = pl.cdiv(SD, MAX_COLS)
        block_cols = 128 * pl.cdiv(SD, 128 * n_col)   # 128-aligned, ~equal blocks
    n_col = pl.cdiv(SD, block_cols)

    # ~4 MiB of x per block; 2*(x)+2*(out)+2*(pe) stays < ~20 MiB, safe on
    # v7x's 64 MiB VMEM as well as v5e/v6e's 128 MiB.
    rows_budget = max(1, (4 << 20) // (block_cols * itemsize))
    if B <= rows_budget:
        block_rows = B
    else:
        block_rows = min(B, max(8, (rows_budget // 8) * 8))
    n_row = pl.cdiv(B, block_rows)

    # v7x has 2 TensorCores: give a non-tiny problem >= 2 programs on a
    # "parallel" axis instead of a collapsed (1, 1) grid.
    if n_row == 1 and n_col == 1 and B * SD * itemsize >= (1 << 20):
        if SD % 256 == 0:
            block_cols = SD // 2                  # two equal 128-aligned halves
            n_col = 2
        elif B % 16 == 0:
            block_rows = B // 2                   # halves stay multiples of 8
            n_row = 2
    return block_rows, block_cols, n_row, n_col


def positional_encoding(x, pe, *, dropout_rate=0.0, seed=0,
                        min_kernel_elements=1 << 15):
    """x: (B, S, D), pe: (max_len, D) f32 -> (B, S, D) in x.dtype."""
    B, S, D = x.shape
    assert pe.shape[0] >= S and pe.shape[1] == D
    SD = S * D

    if B * SD < min_kernel_elements:
        # Few-KiB problem: pallas_call launch overhead dominates, let XLA fuse.
        y = x.astype(jnp.float32) + pe[None, :S, :]
        if dropout_rate > 0.0:
            keep = jax.random.bernoulli(jax.random.PRNGKey(seed),
                                        1.0 - dropout_rate, y.shape)
            y = jnp.where(keep, y / (1.0 - dropout_rate), 0.0)
        return y.astype(x.dtype)

    # Lane-dense flattening (contiguous reshape -> free in XLA).
    x2 = x.reshape(B, SD)
    pe2 = pe[:S].reshape(1, SD).astype(jnp.float32)

    block_rows, block_cols, n_row, n_col = _choose_blocks(B, SD, x.dtype.itemsize)

    # Scoped-VMEM limit covering the double-buffered blocks (+1 MiB headroom).
    blk = block_rows * block_cols
    vmem_need = (2 * blk * x.dtype.itemsize          # x blocks
                 + 2 * blk * x.dtype.itemsize        # out blocks
                 + 2 * block_cols * 4                # pe slab
                 + (1 << 20))
    vmem_limit = int(min(max(vmem_need, 32 << 20), 48 << 20))

    seed_arr = jnp.array([seed], dtype=jnp.int32)
    kernel = functools.partial(pe_add_kernel,
                               dropout_rate=float(dropout_rate), total_cols=SD)

    # Grid ordered (cols, rows): pe's block index (0, j) is constant over the
    # inner (rows) axis, so its tile is not re-fetched every step.
    out2 = pl.pallas_call(
        kernel,
        out_shape=jax.ShapeDtypeStruct((B, SD), x.dtype),
        grid_spec=pltpu.PrefetchScalarGridSpec(
            num_scalar_prefetch=1,
            grid=(n_col, n_row),
            in_specs=[
                pl.BlockSpec((block_rows, block_cols), lambda j, i, seed: (i, j)),
                pl.BlockSpec((1, block_cols), lambda j, i, seed: (0, j)),
            ],
            out_specs=pl.BlockSpec((block_rows, block_cols),
                                   lambda j, i, seed: (i, j)),
        ),
        compiler_params=pltpu.CompilerParams(
            dimension_semantics=("parallel", "parallel"),
            vmem_limit_bytes=vmem_limit),
    )(seed_arr, x2, pe2)
    return out2.reshape(B, S, D)


def ref_positional_encoding(x, pe):
    """Pure-JAX reference of the eval-mode forward (dropout = identity)."""
    return x.astype(jnp.float32) + pe[None, :x.shape[1], :]


if __name__ == "__main__":
    # Small shapes consistent with the module: batch=2, seq=16, d_model=32.
    B, S, D = 2, 16, 32
    max_len = 64

    key = jax.random.PRNGKey(0)
    x = jax.random.normal(key, (B, S, D), dtype=jnp.float32)
    pe = make_positional_encoding_table(D, max_len)              # (max_len, D)

    # --- inference path (dropout identity, matches PyTorch .eval()) ---
    out = jax.block_until_ready(
        positional_encoding(x, pe, min_kernel_elements=0))       # force kernel path
    ref = ref_positional_encoding(x, pe)
    assert out.shape == (B, S, D)
    assert jnp.allclose(out, ref, atol=1e-6, rtol=1e-6), "mismatch vs reference"

    # --- training path (dropout p=0.1 via the in-kernel hash PRNG) ---
    p = 0.1
    out_d = jax.block_until_ready(
        positional_encoding(x, pe, dropout_rate=p, seed=123,
                            min_kernel_elements=0))
    scaled = ref / (1.0 - p)
    elem_ok = (jnp.isclose(out_d, 0.0, atol=1e-6)
               | jnp.isclose(out_d, scaled, atol=1e-5, rtol=1e-5))
    assert bool(jnp.all(elem_ok)), "dropout output not in {0, (x+pe)/(1-p)}"
    keep_frac = float(jnp.mean((out_d != 0.0).astype(jnp.float32)))
    assert 0.70 < keep_frac < 0.995, f"implausible keep fraction {keep_frac}"

    print("KERNEL_OK")
</pallas_src>

<mosaic_0001>
module attributes {stable_mosaic.version = 11 : i64} {
  func.func @pe_add_kernel(%arg0: i32, %arg1: i32, %arg2: memref<1xi32, #tpu.memory_space<smem>>, %arg3: memref<2x512xf32, #tpu.memory_space<vmem>>, %arg4: memref<1x512xf32, #tpu.memory_space<vmem>>, %arg5: memref<2x512xf32, #tpu.memory_space<vmem>>) attributes {dimension_semantics = [#tpu.dimension_semantics<parallel>, #tpu.dimension_semantics<parallel>], iteration_bounds = array<i64: 1, 1>, scalar_prefetch = 1 : i64, scratch_operands = 0 : i64, tpu.core_type = #tpu.core_type<tc>, window_params = [{transform_indices = @transform_0, window_bounds = array<i64: 2, 512>}, {transform_indices = @transform_1, window_bounds = array<i64: 1, 512>}, {transform_indices = @transform_2, window_bounds = array<i64: 2, 512>}]} {
    %c0 = arith.constant 0 : index
    %c0_0 = arith.constant 0 : index
    %0 = vector.load %arg3[%c0, %c0_0] : memref<2x512xf32, #tpu.memory_space<vmem>>, vector<2x512xf32>
    %c0_1 = arith.constant 0 : index
    %c0_2 = arith.constant 0 : index
    %1 = vector.load %arg4[%c0_1, %c0_2] : memref<1x512xf32, #tpu.memory_space<vmem>>, vector<1x512xf32>
    %2 = vector.broadcast %1 : vector<1x512xf32> to vector<2x512xf32>
    %3 = arith.addf %0, %2 : vector<2x512xf32>
    %c0_3 = arith.constant 0 : index
    %c0_4 = arith.constant 0 : index
    %4 = vector.load %arg5[%c0_3, %c0_4] : memref<2x512xf32, #tpu.memory_space<vmem>>, vector<2x512xf32>
    tpu.vector_store %arg5[%c0_3, %c0_4], %3 {strides = array<i32>} : memref<2x512xf32, #tpu.memory_space<vmem>>, vector<2x512xf32>,
    return
  }
  func.func @transform_0(%arg0: i32, %arg1: i32, %arg2: memref<1xi32, #tpu.memory_space<smem>>) -> (i32, i32) {
    %c0_i32 = arith.constant 0 : i32
    return %arg1, %arg0 : i32, i32
  }
  func.func @transform_1(%arg0: i32, %arg1: i32, %arg2: memref<1xi32, #tpu.memory_space<smem>>) -> (i32, i32) {
    %c0_i32 = arith.constant 0 : i32
    %c0_i32_0 = arith.constant 0 : i32
    return %c0_i32, %arg0 : i32, i32
  }
  func.func @transform_2(%arg0: i32, %arg1: i32, %arg2: memref<1xi32, #tpu.memory_space<smem>>) -> (i32, i32) {
    %c0_i32 = arith.constant 0 : i32
    return %arg1, %arg0 : i32, i32
  }
}

</mosaic_0001>

<bundles_post_ra>
// kernel: tpu_custom_call.1
= control target key start
LH: loop header
LB: loop body
LE: loop exit
PB: predicated region body
PF: predicated region fallthrough
CT: control target
= control target key end

     0   :  { %9 = vsyncpa [#allocation5], 0  ;;  %s192_s0 = inlined_call_operand.<no memory space> [shape: s32[1], index: 0, kind: input, shape index: {}]   ;;  %s193_s1 = inlined_call_operand.hbm [shape: f32[2,512], index: 1, kind: input, shape index: {}]   ;;  %s194_s2 = inlined_call_operand.hbm [shape: f32[1,512], index: 2, kind: input, shape index: {}]   ;;  %s195_s3 = inlined_call_operand.hbm [shape: f32[2,512], index: 3, kind: output, shape index: {}]  }
   0x1   :  { %10 = vsyncpa [#allocation8], 0 }
   0x2   :  { %11 = vsyncpa [#allocation6], 0  ;;  %s17_s14 = sshll.u32 %s193_s1, 4  ;;  %s160_s15 = smov [#allocation4]   ;;  %s18_s14 = int_to_ptr.hbm [resolvable:$true] %s17_s14 }
   0x3   :  { %s19_s16 = sshll.u32 %s160_s15, 4  ;;  %s28_s18 = sshll.u32 %s194_s2, 4  ;;  %s20_s16 = int_to_ptr.vmem [resolvable:$true] %s19_s16  ;;  %s29_s18 = int_to_ptr.hbm [resolvable:$true] %s28_s18 }
   0x4   :  { %22 = dma.hbm_to_vmem [thread:$0]  %s18_s14, 128, %s20_s16, [#allocation5]  }
   0x5   :  { %s161_s19 = smov [#allocation7]  }
   0x6   :  { %s30_s20 = sshll.u32 %s161_s19, 4  ;;  %s31_s20 = int_to_ptr.vmem [resolvable:$true] %s30_s20 }
   0x7   :  { %33 = dma.hbm_to_vmem [thread:$0]  %s29_s18, 64, %s31_s20, [#allocation8]  }
   0x8   :  { %154 = dma.done.wait [#allocation5], 128  }
   0x9   :  { %155 = vsyncadd [#allocation5], 4294967168 }
   0xa   :  { %156 = dma.done.wait [#allocation8], 64  }
   0xb   :  { %157 = vsyncadd [#allocation8], 4294967232  ;;  %v43_v0 = vld [vmem:[#allocation7] sm:$0xf]  ;;  %vm52_vm0 = vcmask 1041408   ;;  %vm54_vm1 = vcmask 1045508  }
   0xc   :  { %v45_v1 = vperm.slane %v43_v0, 0  ;;  %v46_v2 = vperm.slane %v43_v0, 1  ;;  %v47_v3 = vperm.slane %v43_v0, 2  ;;  %v48_v4 = vperm.slane %v43_v0, 3  ;;  %v42_v8 = vld [vmem:[#allocation4] sm:$0xff]  ;;  %s162_s1 = smov [#allocation9]  }
   0xd   :  { %vm56_vm2 = vcmask 1043456   ;;  %s66_s2 = sshll.u32 %s162_s1, 4  ;;  %s68_s23 = sshll.u32 %s195_s3, 4  ;;  %s67_s2 = int_to_ptr.vmem [resolvable:$true] %s66_s2  ;;  %s69_s23 = int_to_ptr.hbm [resolvable:$true] %s68_s23 }
   0xe   :  { %v49_v5 = vrot.slane %v46_v2, 6  ;;  %v50_v6 = vrot.slane %v47_v3, 4  ;;  %v51_v7 = vrot.slane %v48_v4, 2 }
  0x10   :  { %v53_v9 = vsel %vm52_vm0, %v45_v1, %v49_v5  ;;  %v55_v10 = vsel %vm54_vm1, %v50_v6, %v51_v7 }
  0x11   :  { %v57_v11 = vsel %vm56_vm2, %v53_v9, %v55_v10 }
  0x12   :  { %v59_v12 = vadd.f32 %v57_v11, %v42_v8 }
  0x14   :  { %60 = vst [vmem:[#allocation9] sm:$0xff] %v59_v12 }
  0x15   :  { %71 = dma.vmem_to_hbm [thread:$0]  %s67_s2, 128, %s69_s23, [#allocation6]  }
  0x16   :  { %158 = dma.done.wait [#allocation6], 128  }
  0x17   :  { %159 = vsyncadd [#allocation6], 4294967168 }
  0x18   :  { %76 = vsyncpa [#allocation5], 1 }
  0x19   :  { %77 = vsyncpa [#allocation8], 1 }
  0x1a   :  { %78 = vsyncpa [#allocation6], 1 }

</bundles_post_ra>
